<compile_context>
chip_gen: v6e
topology: v6e:2x2x1
jax: 0.10.0
libtpu: 0.0.40
codegen_flags: <defaults>
</compile_context>

<pallas_src>
import jax
import jax.numpy as jnp
from jax.experimental import pallas as pl
from jax.experimental.pallas import tpu as pltpu


_NEG_LARGE = -1e30  # pad-column bias: exp(-1e30 - m) underflows to exactly 0 in f32


def _round_up(x, m):
    return ((x + m - 1) // m) * m


def _cdiv(a, b):
    return (a + b - 1) // b


# ---------------------------------------------------------------------------
# Stage 1: split-K partial hidden sums.
#   grid = (B_pad//TB, num_splits, steps_per_split)
#   dims = ("parallel", "parallel", "arbitrary")  -> split axis shards across v7x TCs.
#   x:  (TB, TK) bf16     w1: (TK, HID_pad) bf16     part: (TB, HID_pad) f32 (resident acc)
# ---------------------------------------------------------------------------
def hidden_partial_kernel(x_ref, w1_ref, part_ref):
    @pl.when(pl.program_id(2) == 0)
    def _():
        part_ref[...] = jnp.zeros_like(part_ref)

    # bf16 x bf16 -> f32 accumulate: native MXU path, no per-step weight upcast.
    part_ref[...] += jnp.dot(x_ref[...], w1_ref[...],
                             preferred_element_type=jnp.float32)


# ---------------------------------------------------------------------------
# Stage 2: combine splits + bias + ReLU + second matmul + softmax.
#   part: (S, TB, HID_pad) f32   b1: (1, HID_pad) f32
#   w2:   (HID_pad, KP) bf16     b2: (1, KP) f32 (pad cols = -1e30)   out: (TB, KP) f32
# ---------------------------------------------------------------------------
def epilogue_softmax_kernel(part_ref, b1_ref, w2_ref, b2_ref, out_ref):
    h = jnp.sum(part_ref[...], axis=0) + b1_ref[...]          # combine split partials
    h = jnp.maximum(h, 0.0).astype(jnp.bfloat16)              # ReLU, bf16 for MXU
    logits = jnp.dot(h, w2_ref[...],
                     preferred_element_type=jnp.float32) + b2_ref[...]
    m = jnp.max(logits, axis=1, keepdims=True)                # XLU lane reduce
    e = jnp.exp(logits - m)                                   # EUP; pad cols -> exactly 0
    out_ref[...] = e / jnp.sum(e, axis=1, keepdims=True)      # exact normalization


def prepare_classifier_params(w1, b1, w2, b2, *, num_splits=2, max_tk=16384, tb=8):
    """One-time weight prep (cast + pad) hoisted out of the per-call path."""
    D, HID = w1.shape
    K = w2.shape[1]
    HID_pad = _round_up(HID, 128)
    KP = _round_up(K, 128)                               # lane-dense output width

    D128 = _round_up(D, 128)
    per_split = _cdiv(D128, num_splits)
    steps_per_split = max(1, _cdiv(per_split, max_tk))
    TK = _round_up(_cdiv(per_split, steps_per_split), 128)   # big, lane-aligned, low waste
    D_pad = num_splits * steps_per_split * TK

    w1_p = jnp.pad(w1.astype(jnp.bfloat16), ((0, D_pad - D), (0, HID_pad - HID)))
    b1_p = jnp.pad(b1.reshape(1, HID).astype(jnp.float32), ((0, 0), (0, HID_pad - HID)))
    w2_p = jnp.pad(w2.astype(jnp.bfloat16), ((0, HID_pad - HID), (0, KP - K)))
    b2_p = jnp.pad(b2.reshape(1, K).astype(jnp.float32), ((0, 0), (0, KP - K)),
                   constant_values=_NEG_LARGE)

    return dict(w1=w1_p, b1=b1_p, w2=w2_p, b2=b2_p, D=D, K=K,
                tb=tb, tk=TK, num_splits=num_splits,
                steps_per_split=steps_per_split,
                d_pad=D_pad, hid_pad=HID_pad, kp=KP)


def classify_and_softmax(images_nchw, params):
    """softmax(network_model(images), dim=1) via two Pallas calls (split-K + epilogue)."""
    B = images_nchw.shape[0]
    # NCHW -> [B, C*H*W] row-major flatten (matches torch .view); bf16 activations.
    x = images_nchw.reshape(B, -1).astype(jnp.bfloat16)
    assert x.shape[1] == params["D"]

    TB, TK = params["tb"], params["tk"]
    S, SPS = params["num_splits"], params["steps_per_split"]
    D_pad, HID_pad, KP = params["d_pad"], params["hid_pad"], params["kp"]
    B_pad = _round_up(B, TB)

    x_p = jnp.pad(x, ((0, B_pad - B), (0, D_pad - params["D"])))

    # ---- stage 1: partial hidden sums over a parallel split of D ----
    partials = pl.pallas_call(
        hidden_partial_kernel,
        out_shape=jax.ShapeDtypeStruct((S, B_pad, HID_pad), jnp.float32),
        grid_spec=pltpu.PrefetchScalarGridSpec(
            num_scalar_prefetch=0,
            grid=(B_pad // TB, S, SPS),
            in_specs=[
                pl.BlockSpec((TB, TK), lambda b, s, k: (b, s * SPS + k)),        # x tile
                pl.BlockSpec((TK, HID_pad), lambda b, s, k: (s * SPS + k, 0)),   # w1 tile
            ],
            out_specs=pl.BlockSpec((None, TB, HID_pad), lambda b, s, k: (s, b, 0)),
        ),
        compiler_params=pltpu.CompilerParams(
            dimension_semantics=("parallel", "parallel", "arbitrary"),
            vmem_limit_bytes=64 << 20),
    )(x_p, params["w1"])

    # ---- stage 2: tiny combine + w2 + softmax epilogue ----
    out = pl.pallas_call(
        epilogue_softmax_kernel,
        out_shape=jax.ShapeDtypeStruct((B_pad, KP), jnp.float32),
        grid_spec=pltpu.PrefetchScalarGridSpec(
            num_scalar_prefetch=0,
            grid=(B_pad // TB,),
            in_specs=[
                pl.BlockSpec((S, TB, HID_pad), lambda b: (0, b, 0)),   # partial sums
                pl.BlockSpec((1, HID_pad), lambda b: (0, 0)),          # b1
                pl.BlockSpec((HID_pad, KP), lambda b: (0, 0)),         # w2 (bf16)
                pl.BlockSpec((1, KP), lambda b: (0, 0)),               # b2 (-1e30 pads)
            ],
            out_specs=pl.BlockSpec((TB, KP), lambda b: (b, 0)),
        ),
        compiler_params=pltpu.CompilerParams(dimension_semantics=("parallel",)),
    )(partials, params["b1"], params["w2"], params["b2"])

    return out[:B, :params["K"]]


def get_points_from_angles(distance, elevation_deg, azimuth_deg):
    """nr.get_points_from_angles (degrees). Tiny scalar trig -> plain jnp (no kernel)."""
    el = jnp.deg2rad(elevation_deg)
    az = jnp.deg2rad(azimuth_deg)
    cos_el = jnp.cos(el)
    return jnp.stack([distance * cos_el * jnp.sin(az),
                      distance * jnp.sin(el),
                      -distance * cos_el * jnp.cos(az)])


def renderer_model_2_forward(eval_point, camera_distance, vertices, faces, textures,
                             classifier_params, img_key, image_size):
    """Functional equivalent of renderer_model_2.forward(eval_point)."""
    azimuth, elevation = eval_point[0], eval_point[1]     # replaces .data.set_() mutation

    # self.renderer.eye = nr.get_points_from_angles(dist, elevation, azimuth)
    eye = get_points_from_angles(camera_distance, elevation, azimuth)

    # TODO(synk): nr.Renderer(camera_mode='look_at') mesh rasterization (vertices, faces,
    # textures -> RGB images) has no clean Pallas equivalent; deterministic placeholder.
    images = jax.random.uniform(img_key, (1, 3, image_size, image_size), jnp.float32)

    # prop = softmax(network_model(images), dim=1)
    prop = classify_and_softmax(images, classifier_params)
    return prop, eye


if __name__ == "__main__":
    key = jax.random.PRNGKey(0)
    kv, kw1, kw2, kimg = jax.random.split(key, 4)

    # small shapes consistent with the module
    image_size = 16
    B, C = 1, 3
    D = C * image_size * image_size            # 768
    HID, K = 128, 16                           # network_model hidden / class dims

    # buffers mirroring __init__ (only needed by the rasterizer, kept for fidelity)
    nv, nf, texture_size = 8, 12, 2
    vertices = jax.random.normal(kv, (1, nv, 3), jnp.float32)
    faces = jnp.zeros((1, nf, 3), jnp.int32)
    textures = jnp.ones((1, nf, texture_size, texture_size, texture_size, 3), jnp.float32)
    camera_distance = jnp.float32(2.732)

    # deterministic network_model parameters (2-layer MLP classifier)
    w1 = jax.random.normal(kw1, (D, HID), jnp.float32) * 0.02
    b1 = jnp.zeros((1, HID), jnp.float32)
    w2 = jax.random.normal(kw2, (HID, K), jnp.float32) * 0.02
    b2 = jnp.zeros((1, K), jnp.float32)

    # weight cast + padding hoisted: done once at model init, not per forward call
    params = prepare_classifier_params(w1, b1, w2, b2, num_splits=2, max_tk=16384)

    # eval_point = (azimuth, elevation) in degrees
    eval_point = (jnp.float32(45.0), jnp.float32(30.0))

    prop, eye = renderer_model_2_forward(eval_point, camera_distance, vertices, faces,
                                         textures, params, kimg, image_size)
    jax.block_until_ready(prop)
    jax.block_until_ready(eye)

    # ---- checks against a pure-JAX reference (same bf16 rounding as the kernel) ----
    images_ref = jax.random.uniform(kimg, (1, 3, image_size, image_size), jnp.float32)
    x_ref = images_ref.reshape(B, -1).astype(jnp.bfloat16)
    h_ref = jnp.maximum(
        jnp.dot(x_ref, w1.astype(jnp.bfloat16), preferred_element_type=jnp.float32) + b1,
        0.0)
    logits_ref = jnp.dot(h_ref.astype(jnp.bfloat16), w2.astype(jnp.bfloat16),
                         preferred_element_type=jnp.float32) + b2
    prop_ref = jax.nn.softmax(logits_ref, axis=1)

    assert prop.shape == (B, K)
    assert eye.shape == (3,)
    assert abs(float(jnp.sum(prop)) - 1.0) < 1e-4            # exact softmax normalization
    assert bool(jnp.allclose(prop, prop_ref, atol=5e-3))     # matches reference MLP+softmax
    print("KERNEL_OK")
</pallas_src>

<mosaic_0001>
module attributes {stable_mosaic.version = 11 : i64} {
  func.func @hidden_partial_kernel(%arg0: i32, %arg1: i32, %arg2: i32, %arg3: memref<8x384xbf16, #tpu.memory_space<vmem>>, %arg4: memref<384x128xbf16, #tpu.memory_space<vmem>>, %arg5: memref<1x8x128xf32, #tpu.memory_space<vmem>>) attributes {dimension_semantics = [#tpu.dimension_semantics<parallel>, #tpu.dimension_semantics<parallel>, #tpu.dimension_semantics<arbitrary>], iteration_bounds = array<i64: 1, 2, 1>, scalar_prefetch = 0 : i64, scratch_operands = 0 : i64, tpu.core_type = #tpu.core_type<tc>, window_params = [{transform_indices = @transform_0, window_bounds = array<i64: 8, 384>}, {transform_indices = @transform_1, window_bounds = array<i64: 384, 128>}, {transform_indices = @transform_2, window_bounds = array<i64: 1, 8, 128>}]} {
    %c0_i32 = arith.constant 0 : i32
    %0 = arith.cmpi eq, %arg2, %c0_i32 : i32
    %1 = arith.extui %0 : i1 to i32
    %c0_i32_0 = arith.constant 0 : i32
    %2 = arith.cmpi ne, %1, %c0_i32_0 : i32
    scf.if %2 {
      %cst_10 = arith.constant 0.000000e+00 : f32
      %12 = vector.broadcast %cst_10 : f32 to vector<8x128xf32>
      %c0_11 = arith.constant 0 : index
      %c0_12 = arith.constant 0 : index
      %c0_13 = arith.constant 0 : index
      %13 = vector.load %arg5[%c0_11, %c0_12, %c0_13] : memref<1x8x128xf32, #tpu.memory_space<vmem>>, vector<1x8x128xf32>
      %14 = vector.shape_cast %13 : vector<1x8x128xf32> to vector<8x128xf32>
      %15 = vector.shape_cast %12 : vector<8x128xf32> to vector<1x8x128xf32>
      tpu.vector_store %arg5[%c0_11, %c0_12, %c0_13], %15 {strides = array<i32>} : memref<1x8x128xf32, #tpu.memory_space<vmem>>, vector<1x8x128xf32>,
    } else {
    }
    %c0 = arith.constant 0 : index
    %c0_1 = arith.constant 0 : index
    %c0_2 = arith.constant 0 : index
    %3 = vector.load %arg5[%c0, %c0_1, %c0_2] : memref<1x8x128xf32, #tpu.memory_space<vmem>>, vector<1x8x128xf32>
    %4 = vector.shape_cast %3 : vector<1x8x128xf32> to vector<8x128xf32>
    %c0_3 = arith.constant 0 : index
    %c0_4 = arith.constant 0 : index
    %5 = vector.load %arg3[%c0_3, %c0_4] : memref<8x384xbf16, #tpu.memory_space<vmem>>, vector<8x384xbf16>
    %c0_5 = arith.constant 0 : index
    %c0_6 = arith.constant 0 : index
    %6 = vector.load %arg4[%c0_5, %c0_6] : memref<384x128xbf16, #tpu.memory_space<vmem>>, vector<384x128xbf16>
    %cst = arith.constant dense<0.000000e+00> : vector<8x128xf32>
    %7 = tpu.matmul %5, %6, %cst {dimension_numbers = #tpu.dot_dimension_numbers<[1], [0], [0], [1], [0, 0, 1, 1], [], []>} : vector<8x384xbf16>, vector<384x128xbf16>, vector<8x128xf32> -> vector<8x128xf32>
    %8 = arith.addf %4, %7 : vector<8x128xf32>
    %c0_7 = arith.constant 0 : index
    %c0_8 = arith.constant 0 : index
    %c0_9 = arith.constant 0 : index
    %9 = vector.load %arg5[%c0_7, %c0_8, %c0_9] : memref<1x8x128xf32, #tpu.memory_space<vmem>>, vector<1x8x128xf32>
    %10 = vector.shape_cast %9 : vector<1x8x128xf32> to vector<8x128xf32>
    %11 = vector.shape_cast %8 : vector<8x128xf32> to vector<1x8x128xf32>
    tpu.vector_store %arg5[%c0_7, %c0_8, %c0_9], %11 {strides = array<i32>} : memref<1x8x128xf32, #tpu.memory_space<vmem>>, vector<1x8x128xf32>,
    return
  }
  func.func @transform_0(%arg0: i32, %arg1: i32, %arg2: i32) -> (i32, i32) {
    %c1_i32 = arith.constant 1 : i32
    %0 = arith.muli %arg1, %c1_i32 : i32
    %1 = arith.addi %0, %arg2 : i32
    %c0_i32 = arith.constant 0 : i32
    return %arg0, %1 : i32, i32
  }
  func.func @transform_1(%arg0: i32, %arg1: i32, %arg2: i32) -> (i32, i32) {
    %c1_i32 = arith.constant 1 : i32
    %0 = arith.muli %arg1, %c1_i32 : i32
    %1 = arith.addi %0, %arg2 : i32
    %c0_i32 = arith.constant 0 : i32
    %c0_i32_0 = arith.constant 0 : i32
    return %1, %c0_i32 : i32, i32
  }
  func.func @transform_2(%arg0: i32, %arg1: i32, %arg2: i32) -> (i32, i32, i32) {
    %c0_i32 = arith.constant 0 : i32
    %c0_i32_0 = arith.constant 0 : i32
    return %arg1, %arg0, %c0_i32 : i32, i32, i32
  }
}

</mosaic_0001>

<bundles_post_ra>
// kernel: tpu_custom_call.1
= control target key start
LH: loop header
LB: loop body
LE: loop exit
PB: predicated region body
PF: predicated region fallthrough
CT: control target
= control target key end

     0   :  { %7 = vsyncpa [#allocation3], 0  ;;  %s1205_s0 = inlined_call_operand.hbm [shape: bf16[8,768], index: 0, kind: input, shape index: {}]   ;;  %s1206_s1 = inlined_call_operand.hbm [shape: bf16[768,128], index: 1, kind: input, shape index: {}]   ;;  %s1207_s2 = inlined_call_operand.hbm [shape: f32[2,8,128], index: 2, kind: output, shape index: {}]  }
   0x1   :  { %9 = vsyncpa [#allocation3 + $0x1], 0 }
   0x2   :  { %10 = vsyncpa [#allocation6], 0 }
   0x3   :  { %12 = vsyncpa [#allocation6 + $0x1], 0 }
   0x4   :  { %13 = vsyncpa [#allocation4], 0 }
   0x5   :  { %15 = vsyncpa [#allocation4 + $0x1], 0  ;;  %s1012_s9 = smov 0   ;;  %s1014_s10 = smov 0  }
   0x6   :  { %s1016_s11 = smov 0   ;;  %s1018_s12 = smov 0  }
   0x7   :  { %s1020_s13 = smov 0   ;;  %s1022_s14 = smov 0  }
   0x8 LB: > { %s654_s15 = sadd.s32 4294967295, %s988_s14   ;;  %s655_s16 = sadd.s32 4294967294, %s988_s14   ;;  %s988_s14 = sphi %s1022_s14, %s21_s14   ;;  %s984_s13 = sphi %s1020_s13, %s1219_s13   ;;  %s980_s12 = sphi %s1018_s12, %s1218_s12   ;;  %s976_s11 = sphi %s1016_s11, %s1217_s11   ;;  %s972_s10 = sphi %s1014_s10, %s1216_s10   ;;  %s968_s9 = sphi %s1012_s9, %s1215_s9  }
   0x9   : > { %s36_s17 = sadd.s32 1, %s984_s13  ;;  %s51_s18 = sadd.s32 1, %s976_s11 }
   0xa   : > { %p38_p0 = scmp.ge.s32.totalorder %s36_s17, 2  ;;  %p58_p1 = scmp.ne.s32.totalorder %s976_s11, %s972_s10 }
   0xb   : > { %p59_p2 = scmp.eq.s32.totalorder %s988_s14, 0  ;;  %p64_p3 = scmp.ne.s32.totalorder %s972_s10, %s968_s9 }
   0xc   : > { %s1221_s17 = smov (%p38_p0, %s36_s17), 0  ;;  %p65_p5 = scmp.eq.s32.totalorder %s654_s15, 0 }
   0xd   : > { %p1053_p4 = por %p59_p2, %p58_p1  ;;  %s47_s20 = ssub.s32 %s984_s13, %s1221_s17 }
   0xe   : > { %p118_p6 = scmp.eq.s32.totalorder %s654_s15, 1  ;;  %p49_p7 = scmp.eq.s32.totalorder %s47_s20, 0 }
   0xf   : > { %p1059_p8 = por %p65_p5, %p64_p3  ;;  %p124_p10 = scmp.eq.s32.totalorder %s655_s16, 1 }
  0x10   : > { %p1063_p9 = por %p118_p6, %p58_p1  ;;  %p767_p13 = scmp.lt.s32.totalorder %s988_s14, 2 }
  0x11   : > { %s1068_s23 = scalar_select %p49_p7, %s976_s11, %s51_s18  }
  0x12   : > { %p1070_p11 = por %p124_p10, %p64_p3  ;;  %s1077_s25 = sand.u32 1, %s976_s11  }
  0x13   : > { %s746_s26 = smul.u32 12, %s1077_s25  ;;  %p1083_p0 = pnand %p767_p13, %p1053_p4 }
  0x14   : > { %s693_s27 = smul.u32 192, %s984_s13  ;;  %p660_p1 = scmp.ge.s32.totalorder %s988_s14, 1 }
  0x15   : > { %s148_s4 = scalar_lea.vmem [#allocation2], %s746_s26  ;;  %s145_s6 = scalar_lea.sflag [#allocation3], %s1077_s25 }
  0x16   : > { %s157_s3 = scalar_lea.hbm %s1205_s0, %s693_s27  ;;  %s159_s5 = sshll.u32 %s148_s4, 4  ;;  %s160_s5 = int_to_ptr.vmem [resolvable:$true] %s159_s5 }
  0x17   : > { %p850_p2 = pneg %p1083_p0  ;;  %s861_s7 = scalar_lea.vmem %s160_s5, 192 }
  0x18   : > { %p862_p3 = scmp.ne.s32.totalorder %s160_s5, %s861_s7  ;;  %s990_s8 = smov [#allocation2]  }
  0x19   : > { %s866_s15 = sshll.u32 %s990_s8, 4  ;;  %s867_s15 = int_to_ptr.vmem [resolvable:$false] %s866_s15 }
  0x1a   : > { %p864_p4 = pnand %p862_p3, %p850_p2  ;;  %s868_s16 = scalar_lea.vmem %s867_s15, 384 }
  0x1b   : > { %p869_p6 = scmp.lt.s32.totalorder %s160_s5, %s867_s15  ;;  %p870_p7 = scmp.lt.s32.totalorder %s868_s16, %s861_s7 }
  0x1c   : > { %p865_p5 = pneg %p864_p4 }
  0x1d   : > { %p871_p10 = por %p870_p7, %p869_p6 }
  0x1f   : > { %p872_p13 = pnand %p871_p10, %p865_p5 }
  0x21   : > { %875 = shalt.err (!%p872_p13)
}
  0x22   : > { %759 = dma.hbm_to_vmem [thread:$0]  (!%p1083_p0), %s157_s3, 192, %s160_s5, %s145_s6  }
  0x23   : > { %p186_p3 = scmp.lt.s32.totalorder %s988_s14, 3  ;;  %s747_s18 = smul.u32 192, %s1077_s25 }
  0x24   : > { %s694_s20 = smul.u32 3072, %s984_s13  ;;  %s167_s7 = scalar_lea.sflag [#allocation6], %s1077_s25 }
  0x25   : > { %p1103_p4 = pnand %p660_p1, %p186_p3  ;;  %s170_s30 = scalar_lea.vmem [#allocation5], %s747_s18 }
  0x26   : > { %s177_s29 = scalar_lea.hbm %s1206_s1, %s694_s20  ;;  %s178_s4 = sshll.u32 %s170_s30, 4  ;;  %s179_s4 = int_to_ptr.vmem [resolvable:$true] %s178_s4 }
  0x27   : > { %s889_s8 = scalar_lea.vmem %s179_s4, 3072  ;;  %s991_s3 = smov [#allocation5]  }
  0x28   : > { %p890_p5 = scmp.ne.s32.totalorder %s179_s4, %s889_s8  ;;  %s894_s5 = sshll.u32 %s991_s3, 4  ;;  %s895_s5 = int_to_ptr.vmem [resolvable:$false] %s894_s5 }
  0x29   : > { %s896_s6 = scalar_lea.vmem %s895_s5, 6144  ;;  %p897_p1 = scmp.lt.s32.totalorder %s179_s4, %s895_s5 }
  0x2a   : > { %p892_p6 = pnand %p890_p5, %p850_p2  ;;  %p898_p10 = scmp.lt.s32.totalorder %s896_s6, %s889_s8 }
  0x2c   : > { %p893_p7 = pneg %p892_p6  ;;  %p899_p13 = por %p898_p10, %p897_p1 }
  0x2e   : > { %p900_p3 = pnand %p899_p13, %p893_p7 }
  0x30   : > { %903 = shalt.err (!%p900_p3)
}
  0x31   : > { %s992_s15 = smov 64   ;;  %s993_s16 = smov 4  }
  0x32   : > { %762 = dma.hbm_to_vmem [thread:$0]  (!%p1083_p0), %s177_s29, 3072, %s179_s4, %s167_s7, %s992_s15, %s992_s15, %s993_s16  }
  0x33   : > { %190 = sbr.rel (%p1103_p4) target bundleno = 307 (0x133), region = 28  ;;  %s1120_s25 = sand.u32 (!%p1103_p4), 1, %s972_s10  }
  0x34   : > { %s748_s18 = smul.u32 (!%p1103_p4), 12, %s1120_s25  ;;  %s193_s20 = scalar_lea.sflag (!%p1103_p4), [#allocation3], %s1120_s25 }
  0x36   : > { %s1124_s26 = scalar_lea.vmem (!%p1103_p4), [#allocation2], %s748_s18 }
  0x38   : > { %955 = dma.done.wait (%p1059_p8), %s193_s20, 192  }
  0x39   : > { %957 = vsyncadd (%p1059_p8), %s193_s20, 4294967104  ;;  %s749_s28 = smul.u32 192, %s1120_s25  ;;  %s202_s19 = scalar_lea.sflag [#allocation6], %s1120_s25 }
  0x3b   : > { %s1132_s27 = scalar_lea.vmem [#allocation5], %s749_s28 }
  0x3c   : > { %959 = dma.done.wait (%p1059_p8), %s202_s19, 3072  }
  0x3d   : > { %961 = vsyncadd (%p1059_p8), %s202_s19, 4294964224  ;;  %v994_v0 = vmov 0.0   ;;  %vm995_vm0 = vmmov 0   ;;  %v821_v1 = vld [vmem:[%s1132_s27 + $0x78] sm:$0xff]   ;;  %v824_v4 = vld [vmem:[%s1132_s27 + $0x70] sm:$0xff]   ;;  %s661_s21 = sshll.u32 %s1120_s25, 3 }
  0x3e   : > { %726 = vmatprep.subr.bf16.mxu1 %v994_v0  ;;  %742 = vmatprep.mubr.msk.bf16.mxu1 %vm995_vm0, %v994_v0  ;;  %v822_v2 = vld [vmem:[%s1132_s27 + $0xb8] sm:$0xff]   ;;  %v825_v5 = vld [vmem:[%s1132_s27 + $0xb0] sm:$0xff]   ;;  %v827_v7 = vld [vmem:[%s1132_s27 + $0x68] sm:$0xff]   ;;  %s690_s29 = sshll.u32 %s980_s12, 7  ;;  %s230_s30 = scalar_lea.vmem [#allocation7], %s661_s21 }
  0x3f   : > { %695 = vmatprep.subr.bf16.mxu0 %v821_v1  ;;  %v823_v3 = vld [vmem:[%s1132_s27 + $0x38] sm:$0xff]   ;;  %727 = vmatpush3.bf16.msra.mxu1 %v822_v2  ;;  %v826_v6 = vld [vmem:[%s1132_s27 + $0x30] sm:$0xff]   ;;  %v828_v8 = vld [vmem:[%s1132_s27 + $0xa8] sm:$0xff]   ;;  %s544_s4 = sshll.u32 %s230_s30, 4  ;;  %s542_s3 = scalar_lea.hbm %s1207_s2, %s690_s29  ;;  %s545_s4 = int_to_ptr.vmem [resolvable:$true] %s544_s4 }
  0x40   : > { %696 = vmatpush3.bf16.msra.mxu0 %v823_v3  ;;  %728 = vmatprep.subr.bf16.mxu1 %v994_v0  ;;  %v829_v9 = vld [vmem:[%s1132_s27 + $0x28] sm:$0xff]   ;;  %v830_v10 = vld [vmem:[%s1132_s27 + $0x60] sm:$0xff]   ;;  %v833_v13 = vld [vmem:[%s1132_s27 + $0x58] sm:$0xff]   ;;  %s530_s5 = scalar_lea.sflag [#allocation4], %s1120_s25  ;;  %s904_s6 = scalar_lea.vmem %s545_s4, 128 }
  0x41   : > { %697 = vmatprep.subr.bf16.mxu0 %v824_v4  ;;  %v831_v11 = vld [vmem:[%s1132_s27 + $0xa0] sm:$0xff]   ;;  %v834_v14 = vld [vmem:[%s1132_s27 + $0x98] sm:$0xff]   ;;  %v836_v16 = vld [vmem:[%s1132_s27 + $0x50] sm:$0xff]   ;;  %p905_p8 = scmp.ne.s32.totalorder %s545_s4, %s904_s6  ;;  %s996_s15 = smov [#allocation7]  }
  0x42   : > { %v832_v12 = vld [vmem:[%s1132_s27 + $0x20] sm:$0xff]   ;;  %v835_v15 = vld [vmem:[%s1132_s27 + $0x18] sm:$0xff]   ;;  %v837_v17 = vld [vmem:[%s1132_s27 + $0x90] sm:$0xff]   ;;  %s908_s16 = sshll.u32 %s996_s15, 4  ;;  %s909_s16 = int_to_ptr.vmem [resolvable:$false] %s908_s16 }
  0x43   : > { %729 = vmatpush3.bf16.msra.mxu1 %v825_v5  ;;  %v838_v18 = vld [vmem:[%s1132_s27 + $0x10] sm:$0xff]   ;;  %v839_v19 = vld [vmem:[%s1132_s27 + $0x48] sm:$0xff]   ;;  %v842_v23 = vld [vmem:[%s1132_s27 + $0x40] sm:$0xff]   ;;  %p906_p0 = pnand %p905_p8, %p1063_p9  ;;  %s910_s12 = scalar_lea.vmem %s909_s16, 256 }
  0x44   : > { %698 = vmatpush3.bf16.msra.mxu0 %v826_v6  ;;  %730 = vmatprep.subr.bf16.mxu1 %v994_v0  ;;  %v840_v20 = vld [vmem:[%s1132_s27 + $0x88] sm:$0xff]   ;;  %v843_v25 = vld [vmem:[%s1132_s27 + $0x80] sm:$0xff]   ;;  %v847_v27 = vld [vmem:[%s1124_s26 + $0x8] ss:$0 sps:$4 sm:$0xff]   ;;  %p911_p4 = scmp.lt.s32.totalorder %s545_s4, %s909_s16  ;;  %p912_p5 = scmp.lt.s32.totalorder %s910_s12, %s904_s6 }
  0x45   : > { %699 = vmatprep.subr.bf16.mxu0 %v827_v7  ;;  %v841_v21 = vld [vmem:[%s1132_s27 + $0x8] sm:$0xff]   ;;  %v844_v26 = vld [vmem:[%s1132_s27] sm:$0xff]   ;;  %p907_p2 = pneg %p906_p0 }
  0x46   : > { %v242_v22 = vld [vmem:[%s1124_s26] sm:$0xff]  ;;  %p913_p6 = por %p912_p5, %p911_p4 }
  0x47   : > { %731 = vmatpush3.bf16.msra.mxu1 %v828_v8  ;;  %v663_v24 = vcombine.high %v242_v22, %v242_v22  ;;  %v662_v28 = vcombine.low %v242_v22, %v242_v22 }
  0x48   : > { %700 = vmatpush3.bf16.msra.mxu0 %v829_v9  ;;  %732 = vmatprep.subr.bf16.mxu1 %v994_v0  ;;  %p914_p7 = pnand %p913_p6, %p907_p2 }
  0x49   : > { %701 = vmatprep.subr.bf16.mxu0 %v830_v10  ;;  %479 = vmatprep.mubr.bf16.mxu0 %v663_v24 }
  0x4b   : > { %733 = vmatpush3.bf16.msra.mxu1 %v831_v11 }
  0x4c   : > { %702 = vmatpush3.bf16.msra.mxu0 %v832_v12  ;;  %734 = vmatprep.subr.bf16.mxu1 %v994_v0 }
  0x4d   : > { %703 = vmatprep.subr.bf16.mxu0 %v833_v13 }
  0x4f   : > { %735 = vmatpush3.bf16.msra.mxu1 %v834_v14 }
  0x50   : > { %704 = vmatpush3.bf16.msra.mxu0 %v835_v15  ;;  %736 = vmatprep.subr.bf16.mxu1 %v994_v0 }
  0x51   : > { %705 = vmatprep.subr.bf16.mxu0 %v836_v16 }
  0x53   : > { %737 = vmatpush3.bf16.msra.mxu1 %v837_v17 }
  0x54   : > { %706 = vmatpush3.bf16.msra.mxu0 %v838_v18  ;;  %738 = vmatprep.subr.bf16.mxu1 %v994_v0 }
  0x55   : > { %707 = vmatprep.subr.bf16.mxu0 %v839_v19 }
  0x57   : > { %739 = vmatpush3.bf16.msra.mxu1 %v840_v20 }
  0x58   : > { %708 = vmatpush3.bf16.msra.mxu0 %v841_v21  ;;  %740 = vmatprep.subr.bf16.mxu1 %v994_v0 }
  0x59   : > { %709 = vmatprep.subr.bf16.mxu0 %v842_v23 }
  0x5b   : > { %741 = vmatpush3.bf16.msra.mxu1 %v843_v25 }
  0x5c   : > { %710 = vmatpush3.bf16.msra.mxu0 %v844_v26 }
  0x5e   : > { %743 = vmatmul.mubr.bf16.vlgmr.msra.gmra.mxu1 %v847_v27 }
  0x5f   : > { %480 = vmatmul.mubr.bf16.vlgmr.msra.gmra.mxu0 %v662_v28 }
 0x11e   : > { %v521_v29 = vpop.f32.mrf.mxu1 }
 0x11f   : > { %v711_v30 = vpop.f32.mrf.mxu0 }
 0x120   : > { %v744_v31 = vpop.f32.mrf.mxu1 }
 0x121   : > { %v712_v32 = vpop.f32.mrf.mxu0 }
 0x122   : > { %v713_v33 = vadd.f32 %v712_v32, %v711_v30  ;;  %v524_v34 = vpop.f32.mrf.mxu1 }
 0x123   : > { %v714_v35 = vpop.f32.mrf.mxu0 }
 0x124   : > { %v522_v36 = vadd.f32 %v713_v33, %v521_v29  ;;  %v745_v37 = vpop.f32.mrf.mxu1 }
 0x125   : > { %v715_v38 = vpop.f32.mrf.mxu0 }
 0x126   : > { %528 = vst [vmem:[%s230_s30] sm:$0xff] %v522_v36 }
 0x127   : > { %917 = shalt.err (!%p914_p7)
}
 0x128   : > { %s918_s18 = scalar_lea.hbm %s542_s3, 128  ;;  %s922_s26 = scalar_lea.hbm %s1207_s2, 256 }
 0x129   : > { %p919_p1 = scmp.ne.s32.totalorder %s542_s3, %s918_s18  ;;  %p923_p3 = scmp.lt.s32.totalorder %s542_s3, %s1207_s2 }
 0x12a   : > { %p924_p8 = scmp.lt.s32.totalorder %s922_s26, %s918_s18 }
 0x12b   : > { %p920_p10 = pnand %p919_p1, %p1063_p9 }
 0x12c   : > { %p925_p0 = por %p924_p8, %p923_p3 }
 0x12d   : > { %p921_p13 = pneg %p920_p10 }
 0x12f   : > { %p926_p12 = pnand %p925_p0, %p921_p13 }
 0x131   : > { %929 = shalt.err (!%p926_p12)
}
 0x132   : > { %754 = dma.vmem_to_hbm [thread:$0]  (%p1063_p9), %s545_s4, 128, %s542_s3, %s530_s5  }
 0x133 PF: > { %s556_s27 = sand.u32 1, %s968_s9   ;;  %p1214_p2 = scmp.ge.s32.totalorder %s988_s14, 2 }
 0x134   : > { %s557_s21 = scalar_lea.sflag [#allocation4], %s556_s27 }
 0x135   : > { %p764_p4 = pnand %p1214_p2, %p1070_p11 }
 0x137   : > { %p765_p5 = pneg %p764_p4 }
 0x139   : > { %963 = dma.done.wait (%p765_p5), %s557_s21, 128  }
 0x13a   : > { %965 = vsyncadd (%p765_p5), %s557_s21, 4294967168  ;;  %s21_s14 = sadd.s32 1, %s988_s14   ;;  %s1215_s9 = smov %s972_s10 }
 0x13b   : > { %p18_p6 = scmp.ge.s32.totalorder %s21_s14, 4   ;;  %s1216_s10 = smov %s976_s11 }
 0x13c   : > { %s1217_s11 = smov %s1068_s23  ;;  %s1218_s12 = smov %s984_s13 }
 0x13d   : > { %s1219_s13 = smov %s1221_s17  ;;  %20 = sbr.rel (!%p18_p6) target bundleno = 8 (0x8), region = 90 }
 0x142   :  { %562 = vsyncpa [#allocation3], 1 }
 0x143   :  { %564 = vsyncpa [#allocation3 + $0x1], 1 }
 0x144   :  { %565 = vsyncpa [#allocation6], 1 }
 0x145   :  { %567 = vsyncpa [#allocation6 + $0x1], 1 }
 0x146   :  { %568 = vsyncpa [#allocation4], 1 }
 0x147   :  { %570 = vsyncpa [#allocation4 + $0x1], 1 }

</bundles_post_ra>
